<compile_context>
chip_gen: v5e
topology: v5e:2x2
jax: 0.10.0
libtpu: 0.0.40
codegen_flags: <defaults>
</compile_context>

<pallas_src>
import jax
import jax.numpy as jnp
from jax.experimental import pallas as pl
from jax.experimental.pallas import tpu as pltpu


# ---------------------------------------------------------------------------
# Hardware-gated configuration (VMEM limit + tile targets)
# ---------------------------------------------------------------------------
def _hw_config():
    vmem = None
    try:
        vmem = getattr(pltpu.get_tpu_info(), "vmem_capacity_bytes", None)
    except Exception:
        vmem = None
    if vmem is not None and vmem >= 112 * 1024 * 1024:
        # 128 MiB parts (v5e / v6e): exploit the headroom.
        return dict(vmem_limit=100 * 1024 * 1024,
                    tq_target=1024, tp_target=1024,
                    knn_work_bytes=48 * 1024 * 1024)
    # v7x (64 MiB physical VMEM) or unknown: stay conservative.
    return dict(vmem_limit=40 * 1024 * 1024,
                tq_target=512, tp_target=512,
                knn_work_bytes=16 * 1024 * 1024)


def _pick_tile(total, target, align):
    """Largest `align`-aligned divisor of `total` that is <= target, else `total`."""
    if total <= target:
        return total
    t = (target // align) * align
    while t >= align:
        if total % t == 0:
            return t
        t -= align
    return total


def _prefer_multi_step(total, tile, align, batch):
    """Shrink the tile if the parallel grid would otherwise have < 2 steps
    (v7x shards parallel grid axes across its 2 TensorCores)."""
    if batch * (total // tile) >= 2 or tile <= align:
        return tile
    smaller = _pick_tile(total, max(align, tile // 2), align)
    if batch * (total // smaller) >= 2:
        return smaller
    return tile


# ---------------------------------------------------------------------------
# Kernel 1: fused pairwise score + top-k neighbor indices
#   score[i, j] = <q_i, k_j> - 0.5*||k_j||^2   (per-row order-equivalent to
#   -||q_i - k_j||^2 : the per-row constant -||q_i||^2 and the *2 scale are
#   dropped).  Distances are computed with VPU broadcast-FMAs (C = 3), keys
#   come in channel-major.  Top-k (self included, as in torch `knn`) is done
#   in VMEM with an iterative masked argmax; only (tq, k) indices hit HBM.
# ---------------------------------------------------------------------------
def make_knn_kernel(k):
    def kernel(xq_ref, xk_ref, idx_ref):
        xq = xq_ref[0].astype(jnp.float32)                 # (tq, C)  queries
        xk = xk_ref[0].astype(jnp.float32)                 # (C, N)   keys (channel-major)
        tq, c_dim = xq.shape
        n = xk.shape[1]

        rows = [xk[c:c + 1, :] for c in range(c_dim)]      # (1, N) each
        xx_k = rows[0] * rows[0]
        for c in range(1, c_dim):
            xx_k = xx_k + rows[c] * rows[c]
        d = xq[:, 0:1] * rows[0] - 0.5 * xx_k              # (tq, N) VPU FMAs
        for c in range(1, c_dim):
            d = d + xq[:, c:c + 1] * rows[c]

        # Indices are kept in f32 (exact for N < 2^24) so all reductions /
        # selects stay on well-supported f32 paths.
        col = jax.lax.broadcasted_iota(jnp.int32, (tq, n), 1).astype(jnp.float32)
        kcol = jax.lax.broadcasted_iota(jnp.int32, (tq, k), 1)
        idxb = jnp.zeros((tq, k), jnp.float32)
        for j in range(k):
            m = jnp.max(d, axis=1, keepdims=True)                  # (tq, 1)
            cand = jnp.where(d >= m, col, jnp.float32(n))          # lowest index among maxima
            arg = jnp.min(cand, axis=1, keepdims=True)             # (tq, 1)
            idxb = jnp.where(kcol == j, arg, idxb)
            if j + 1 < k:
                d = jnp.where(col == arg, -jnp.inf, d)             # mask the selected key
        idx_ref[0] = idxb.astype(jnp.int32)
    return kernel


def knn_indices(xyz, xt, k, cfg):
    """xyz: (B, C, N) channel-major; xt: (B, N, C). Returns (B, N, k) int32."""
    B, C, N = xyz.shape
    # Cap the query tile so the in-VMEM (tq, N) working set stays bounded.
    cap = max(8, ((cfg["knn_work_bytes"] // (16 * max(N, 1))) // 8) * 8)
    tq = _pick_tile(N, min(cfg["tq_target"], cap), 8)
    tq = _prefer_multi_step(N, tq, 8, B)

    return pl.pallas_call(
        make_knn_kernel(k),
        out_shape=jax.ShapeDtypeStruct((B, N, k), jnp.int32),
        grid_spec=pltpu.PrefetchScalarGridSpec(
            num_scalar_prefetch=0,
            grid=(B, N // tq),
            in_specs=[
                pl.BlockSpec((1, tq, C), lambda b, i: (b, i, 0)),   # query rows
                pl.BlockSpec((1, C, N), lambda b, i: (b, 0, 0)),    # keys, channel-major
            ],
            out_specs=pl.BlockSpec((1, tq, k), lambda b, i: (b, i, 0))),
        compiler_params=pltpu.CompilerParams(
            dimension_semantics=("parallel", "parallel"),
            vmem_limit_bytes=cfg["vmem_limit"]),
    )(xt, xyz)


# ---------------------------------------------------------------------------
# Kernel 2: fused edge-feature MLP (Conv1d k=1 + folded BN + LeakyReLU) +
#           max over the k neighbors.  Layer 0 ([center, neigh, center-neigh]
#           concat folded into weights) runs on the VPU as broadcast-FMAs; BN
#           scales are folded into weights, so only biases are added here.
# ---------------------------------------------------------------------------
def make_embed_kernel(mlp_num, k, transpose_out, neg_slope=0.1):
    def kernel(xc_ref, xn_ref, *refs):
        out_ref = refs[-1]
        prm = refs[:-1]

        xc = xc_ref[0].astype(jnp.float32)              # (tpn, C)    centers
        xn = xn_ref[0].astype(jnp.float32)              # (tpn*k, C)  gathered neighbors
        tpn, c_dim = xc.shape

        wct = prm[0][...]                               # (C, cout) scale-folded
        wnt = prm[1][...]                               # (C, cout) scale-folded
        b0 = prm[2][...]                                # (1, cout)
        cout = wct.shape[1]

        # Layer 0 on the VPU: 3 broadcast-FMA accumulations per operand.
        hc = xc[:, 0:1] * wct[0:1, :]                   # (tpn, cout)
        hn = xn[:, 0:1] * wnt[0:1, :]                   # (tpn*k, cout)
        for c in range(1, c_dim):
            hc = hc + xc[:, c:c + 1] * wct[c:c + 1, :]
            hn = hn + xn[:, c:c + 1] * wnt[c:c + 1, :]

        h = hn.reshape(tpn, k, cout) + hc[:, None, :] + b0
        h = jnp.where(h > 0, h, neg_slope * h)          # LeakyReLU(0.1)

        if mlp_num > 1:
            h = h.reshape(tpn * k, cout)
            p = 3
            for _ in range(mlp_num - 1):
                wt = prm[p][...]                        # (cin, cout) scale-folded
                b = prm[p + 1][...]                     # (1, cout)
                p += 2
                h = jax.lax.dot_general(h, wt, (((1,), (0,)), ((), ())),
                                        preferred_element_type=jnp.float32) + b
                h = jnp.where(h > 0, h, neg_slope * h)
            cout = h.shape[-1]
            h = h.reshape(tpn, k, cout)

        pooled = jnp.max(h, axis=1)                     # (tpn, cout) max over k
        if transpose_out:
            out_ref[0] = pooled.T.astype(out_ref.dtype)  # lane-dense (cout, tpn)
        else:
            out_ref[0] = pooled.astype(out_ref.dtype)    # cout >= 128: already lane-dense
    return kernel


def embed_forward(xt, neigh, params, k, cfg):
    B, N, C = xt.shape
    mlp_num = len(params)
    cout = params[0][0].shape[0]
    tpn = _pick_tile(N, cfg["tp_target"], 128)
    tpn = _prefer_multi_step(N, tpn, 128, B)
    transpose_out = cout < 128

    # Fold the [center, neigh, center-neigh] concat AND the BN scale into
    # layer-0 weights; fold BN scale into every later layer's weights too.
    w0, s0, b0 = params[0]
    wc = (w0[:, :C] + w0[:, 2 * C:]) * s0[0][:, None]       # (cout, C)
    wn = (w0[:, C:2 * C] - w0[:, 2 * C:]) * s0[0][:, None]  # (cout, C)
    flat_params = [wc.T, wn.T, b0]                           # (C,cout),(C,cout),(1,cout)

    in_specs = [
        pl.BlockSpec((1, tpn, C), lambda b, n: (b, n, 0)),            # centers
        pl.BlockSpec((1, tpn * k, C), lambda b, n: (b, n, 0)),        # neighbors
        pl.BlockSpec((C, cout), lambda b, n: (0, 0)),
        pl.BlockSpec((C, cout), lambda b, n: (0, 0)),
        pl.BlockSpec((1, cout), lambda b, n: (0, 0)),
    ]
    for (w, s, sh) in params[1:]:
        wt = (w * s[0][:, None]).T                                    # (cin, cout)
        flat_params += [wt, sh]
        in_specs.append(pl.BlockSpec(wt.shape, lambda b, n: (0, 0)))
        in_specs.append(pl.BlockSpec(sh.shape, lambda b, n: (0, 0)))

    if transpose_out:
        out_shape = jax.ShapeDtypeStruct((B, cout, N), jnp.float32)
        out_specs = pl.BlockSpec((1, cout, tpn), lambda b, n: (b, 0, n))
    else:
        out_shape = jax.ShapeDtypeStruct((B, N, cout), jnp.float32)
        out_specs = pl.BlockSpec((1, tpn, cout), lambda b, n: (b, n, 0))

    out = pl.pallas_call(
        make_embed_kernel(mlp_num, k, transpose_out),
        out_shape=out_shape,
        grid_spec=pltpu.PrefetchScalarGridSpec(
            num_scalar_prefetch=0,
            grid=(B, N // tpn),
            in_specs=in_specs,
            out_specs=out_specs),
        compiler_params=pltpu.CompilerParams(
            dimension_semantics=("parallel", "parallel"),
            vmem_limit_bytes=cfg["vmem_limit"]),
    )(xt, neigh, *flat_params)

    if not transpose_out:
        out = jnp.transpose(out, (0, 2, 1))
    return out                                                        # (B, cout, N)


# ---------------------------------------------------------------------------
# Full forward
# ---------------------------------------------------------------------------
def input_embedding_forward(xyz, params, k):
    """xyz: (B, C, N); params: list of (W, bn_scale, bn_shift) per MLP layer."""
    cfg = _hw_config()
    B, C, N = xyz.shape
    xyz = xyz.astype(jnp.float32)
    xt = jnp.transpose(xyz, (0, 2, 1))                                # (B, N, C)

    # --- fused distance + top-k (indices only, no (B,N,N) HBM round trip) ---
    idx = knn_indices(xyz, xt, k, cfg)                                # (B, N, k) int32

    # --- gather neighbor coordinates (plain-JAX glue) ---
    # TODO(synk): move this gather in-kernel via scalar-prefetched indices + DMA.
    flat = xt.reshape(B * N, C)
    idx_full = (idx + (jnp.arange(B, dtype=jnp.int32) * N)[:, None, None]).reshape(-1)
    neigh = flat[idx_full].reshape(B, N * k, C)                       # (B, N*k, C)

    return embed_forward(xt, neigh, params, k, cfg)                   # (B, Cout, N)


# ---------------------------------------------------------------------------
# Deterministic parameter init (mirrors shapes from the module __init__)
# ---------------------------------------------------------------------------
def init_params(key, in_channels, out_channels, mlp_num, eps=1e-5):
    params = []
    cin = in_channels * 3
    for _ in range(mlp_num):
        key, k1, k2, k3, k4, k5 = jax.random.split(key, 6)
        bound = 1.0 / jnp.sqrt(cin)
        w = jax.random.uniform(k1, (out_channels, cin), jnp.float32, -bound, bound)
        gamma = jax.random.uniform(k2, (out_channels,), jnp.float32, 0.5, 1.5)
        beta = 0.1 * jax.random.normal(k3, (out_channels,), jnp.float32)
        r_mean = 0.1 * jax.random.normal(k4, (out_channels,), jnp.float32)
        r_var = jax.random.uniform(k5, (out_channels,), jnp.float32, 0.5, 1.5)
        scale = gamma / jnp.sqrt(r_var + eps)
        shift = beta - r_mean * scale
        params.append((w, scale.reshape(1, out_channels), shift.reshape(1, out_channels)))
        cin = out_channels
    return params


# ---------------------------------------------------------------------------
# Pure-JAX reference (same semantics) for a correctness check
# ---------------------------------------------------------------------------
def reference_forward(xyz, params, k):
    B, C, N = xyz.shape
    hp = jax.lax.Precision.HIGHEST
    xt = jnp.transpose(xyz, (0, 2, 1)).astype(jnp.float32)
    g = jnp.einsum('bic,bjc->bij', xt, xt, precision=hp)
    xx = jnp.sum(xt * xt, axis=2)
    d = 2.0 * g - xx[:, :, None] - xx[:, None, :]
    idx = jax.lax.top_k(d, k + 1)[1][..., :k]        # self included, as in torch knn
    flat = xt.reshape(B * N, C)
    idx_full = (idx + (jnp.arange(B) * N)[:, None, None]).reshape(-1)
    neigh = flat[idx_full].reshape(B, N, k, C)
    center = jnp.broadcast_to(xt[:, :, None, :], (B, N, k, C))
    h = jnp.concatenate([center, neigh, center - neigh], axis=3)
    for (w, s, b) in params:
        h = jnp.einsum('bnkc,oc->bnko', h, w, precision=hp) * s[0] + b[0]
        h = jnp.where(h > 0, h, 0.1 * h)
    out = jnp.max(h, axis=2)                                          # (B, N, Cout)
    return jnp.transpose(out, (0, 2, 1))


if __name__ == "__main__":
    B, C, N = 2, 3, 16          # batch, coordinate channels, num points
    K, OUT, MLP = 8, 32, 2      # k neighbors, out_channels, mlp_num

    key = jax.random.PRNGKey(0)
    kx, kp = jax.random.split(key)
    xyz = jax.random.normal(kx, (B, C, N), jnp.float32)
    params = init_params(kp, C, OUT, MLP)

    out = input_embedding_forward(xyz, params, K)
    out = jax.block_until_ready(out)

    ref = reference_forward(xyz, params, K)
    assert out.shape == (B, OUT, N), out.shape
    assert jnp.allclose(out, ref, atol=1e-4, rtol=1e-4), \
        float(jnp.max(jnp.abs(out - ref)))
    print("KERNEL_OK")
</pallas_src>

<mosaic_0001>
module attributes {stable_mosaic.version = 11 : i64} {
  func.func @kernel(%arg0: i32, %arg1: i32, %arg2: memref<1x16x3xf32, #tpu.memory_space<vmem>>, %arg3: memref<1x3x16xf32, #tpu.memory_space<vmem>>, %arg4: memref<1x16x8xi32, #tpu.memory_space<vmem>>) attributes {dimension_semantics = [#tpu.dimension_semantics<parallel>, #tpu.dimension_semantics<parallel>], iteration_bounds = array<i64: 2, 1>, scalar_prefetch = 0 : i64, scratch_operands = 0 : i64, tpu.core_type = #tpu.core_type<tc>, window_params = [{transform_indices = @transform_0, window_bounds = array<i64: 1, 16, 3>}, {transform_indices = @transform_1, window_bounds = array<i64: 1, 3, 16>}, {transform_indices = @transform_2, window_bounds = array<i64: 1, 16, 8>}]} {
    %c0 = arith.constant 0 : index
    %c0_0 = arith.constant 0 : index
    %c0_1 = arith.constant 0 : index
    %0 = vector.load %arg2[%c0, %c0_0, %c0_1] : memref<1x16x3xf32, #tpu.memory_space<vmem>>, vector<1x16x3xf32>
    %1 = vector.shape_cast %0 : vector<1x16x3xf32> to vector<16x3xf32>
    %c0_2 = arith.constant 0 : index
    %c0_3 = arith.constant 0 : index
    %c0_4 = arith.constant 0 : index
    %2 = vector.load %arg3[%c0_2, %c0_3, %c0_4] : memref<1x3x16xf32, #tpu.memory_space<vmem>>, vector<1x3x16xf32>
    %3 = vector.shape_cast %2 : vector<1x3x16xf32> to vector<3x16xf32>
    %4 = vector.extract_strided_slice %3 {offsets = [0, 0], sizes = [1, 16], strides = [1, 1]} : vector<3x16xf32> to vector<1x16xf32>
    %5 = vector.extract_strided_slice %3 {offsets = [1, 0], sizes = [1, 16], strides = [1, 1]} : vector<3x16xf32> to vector<1x16xf32>
    %6 = vector.extract_strided_slice %3 {offsets = [2, 0], sizes = [1, 16], strides = [1, 1]} : vector<3x16xf32> to vector<1x16xf32>
    %7 = arith.mulf %4, %4 : vector<1x16xf32>
    %8 = arith.mulf %5, %5 : vector<1x16xf32>
    %9 = arith.addf %7, %8 : vector<1x16xf32>
    %10 = arith.mulf %6, %6 : vector<1x16xf32>
    %11 = arith.addf %9, %10 : vector<1x16xf32>
    %12 = vector.extract_strided_slice %1 {offsets = [0, 0], sizes = [16, 1], strides = [1, 1]} : vector<16x3xf32> to vector<16x1xf32>
    %13 = vector.broadcast %12 : vector<16x1xf32> to vector<16x16xf32>
    %14 = vector.broadcast %4 : vector<1x16xf32> to vector<16x16xf32>
    %15 = arith.mulf %13, %14 : vector<16x16xf32>
    %cst = arith.constant 5.000000e-01 : f32
    %16 = vector.broadcast %cst : f32 to vector<1x16xf32>
    %17 = arith.mulf %16, %11 : vector<1x16xf32>
    %18 = vector.broadcast %17 : vector<1x16xf32> to vector<16x16xf32>
    %19 = arith.subf %15, %18 : vector<16x16xf32>
    %20 = vector.extract_strided_slice %1 {offsets = [0, 1], sizes = [16, 1], strides = [1, 1]} : vector<16x3xf32> to vector<16x1xf32>
    %21 = vector.broadcast %20 : vector<16x1xf32> to vector<16x16xf32>
    %22 = vector.broadcast %5 : vector<1x16xf32> to vector<16x16xf32>
    %23 = arith.mulf %21, %22 : vector<16x16xf32>
    %24 = arith.addf %19, %23 : vector<16x16xf32>
    %25 = vector.extract_strided_slice %1 {offsets = [0, 2], sizes = [16, 1], strides = [1, 1]} : vector<16x3xf32> to vector<16x1xf32>
    %26 = vector.broadcast %25 : vector<16x1xf32> to vector<16x16xf32>
    %27 = vector.broadcast %6 : vector<1x16xf32> to vector<16x16xf32>
    %28 = arith.mulf %26, %27 : vector<16x16xf32>
    %29 = arith.addf %24, %28 : vector<16x16xf32>
    %30 = tpu.iota {dimensions = array<i32: 1>} : vector<16x16xi32>
    %31 = arith.sitofp %30 : vector<16x16xi32> to vector<16x16xf32>
    %32 = tpu.iota {dimensions = array<i32: 1>} : vector<16x8xi32>
    %cst_5 = arith.constant 0.000000e+00 : f32
    %33 = vector.broadcast %cst_5 : f32 to vector<16x8xf32>
    %cst_6 = arith.constant dense<0xFF800000> : vector<16xf32>
    %34 = vector.multi_reduction <maximumf>, %29, %cst_6 [1] : vector<16x16xf32> to vector<16xf32>
    %35 = vector.shape_cast %34 : vector<16xf32> to vector<16x1xf32>
    %36 = vector.broadcast %35 : vector<16x1xf32> to vector<16x16xf32>
    %37 = arith.cmpf oge, %29, %36 : vector<16x16xf32>
    %cst_7 = arith.constant 1.600000e+01 : f32
    %38 = vector.broadcast %cst_7 : f32 to vector<16x16xf32>
    %39 = arith.select %37, %31, %38 : vector<16x16xi1>, vector<16x16xf32>
    %cst_8 = arith.constant dense<0x7F800000> : vector<16xf32>
    %40 = vector.multi_reduction <minimumf>, %39, %cst_8 [1] : vector<16x16xf32> to vector<16xf32>
    %41 = vector.shape_cast %40 : vector<16xf32> to vector<16x1xf32>
    %c0_i32 = arith.constant 0 : i32
    %42 = vector.broadcast %c0_i32 : i32 to vector<16x8xi32>
    %43 = arith.cmpi eq, %32, %42 : vector<16x8xi32>
    %44 = vector.shape_cast %41 : vector<16x1xf32> to vector<16x1xf32>
    %45 = vector.broadcast %44 : vector<16x1xf32> to vector<16x8xf32>
    %46 = arith.select %43, %45, %33 : vector<16x8xi1>, vector<16x8xf32>
    %47 = vector.broadcast %41 : vector<16x1xf32> to vector<16x16xf32>
    %48 = arith.cmpf oeq, %31, %47 : vector<16x16xf32>
    %cst_9 = arith.constant 0xFF800000 : f32
    %49 = vector.broadcast %cst_9 : f32 to vector<16x16xf32>
    %50 = arith.select %48, %49, %29 : vector<16x16xi1>, vector<16x16xf32>
    %cst_10 = arith.constant dense<0xFF800000> : vector<16xf32>
    %51 = vector.multi_reduction <maximumf>, %50, %cst_10 [1] : vector<16x16xf32> to vector<16xf32>
    %52 = vector.shape_cast %51 : vector<16xf32> to vector<16x1xf32>
    %53 = vector.broadcast %52 : vector<16x1xf32> to vector<16x16xf32>
    %54 = arith.cmpf oge, %50, %53 : vector<16x16xf32>
    %cst_11 = arith.constant 1.600000e+01 : f32
    %55 = vector.broadcast %cst_11 : f32 to vector<16x16xf32>
    %56 = arith.select %54, %31, %55 : vector<16x16xi1>, vector<16x16xf32>
    %cst_12 = arith.constant dense<0x7F800000> : vector<16xf32>
    %57 = vector.multi_reduction <minimumf>, %56, %cst_12 [1] : vector<16x16xf32> to vector<16xf32>
    %58 = vector.shape_cast %57 : vector<16xf32> to vector<16x1xf32>
    %c1_i32 = arith.constant 1 : i32
    %59 = vector.broadcast %c1_i32 : i32 to vector<16x8xi32>
    %60 = arith.cmpi eq, %32, %59 : vector<16x8xi32>
    %61 = vector.shape_cast %58 : vector<16x1xf32> to vector<16x1xf32>
    %62 = vector.broadcast %61 : vector<16x1xf32> to vector<16x8xf32>
    %63 = arith.select %60, %62, %46 : vector<16x8xi1>, vector<16x8xf32>
    %64 = vector.broadcast %58 : vector<16x1xf32> to vector<16x16xf32>
    %65 = arith.cmpf oeq, %31, %64 : vector<16x16xf32>
    %cst_13 = arith.constant 0xFF800000 : f32
    %66 = vector.broadcast %cst_13 : f32 to vector<16x16xf32>
    %67 = arith.select %65, %66, %50 : vector<16x16xi1>, vector<16x16xf32>
    %cst_14 = arith.constant dense<0xFF800000> : vector<16xf32>
    %68 = vector.multi_reduction <maximumf>, %67, %cst_14 [1] : vector<16x16xf32> to vector<16xf32>
    %69 = vector.shape_cast %68 : vector<16xf32> to vector<16x1xf32>
    %70 = vector.broadcast %69 : vector<16x1xf32> to vector<16x16xf32>
    %71 = arith.cmpf oge, %67, %70 : vector<16x16xf32>
    %cst_15 = arith.constant 1.600000e+01 : f32
    %72 = vector.broadcast %cst_15 : f32 to vector<16x16xf32>
    %73 = arith.select %71, %31, %72 : vector<16x16xi1>, vector<16x16xf32>
    %cst_16 = arith.constant dense<0x7F800000> : vector<16xf32>
    %74 = vector.multi_reduction <minimumf>, %73, %cst_16 [1] : vector<16x16xf32> to vector<16xf32>
    %75 = vector.shape_cast %74 : vector<16xf32> to vector<16x1xf32>
    %c2_i32 = arith.constant 2 : i32
    %76 = vector.broadcast %c2_i32 : i32 to vector<16x8xi32>
    %77 = arith.cmpi eq, %32, %76 : vector<16x8xi32>
    %78 = vector.shape_cast %75 : vector<16x1xf32> to vector<16x1xf32>
    %79 = vector.broadcast %78 : vector<16x1xf32> to vector<16x8xf32>
    %80 = arith.select %77, %79, %63 : vector<16x8xi1>, vector<16x8xf32>
    %81 = vector.broadcast %75 : vector<16x1xf32> to vector<16x16xf32>
    %82 = arith.cmpf oeq, %31, %81 : vector<16x16xf32>
    %cst_17 = arith.constant 0xFF800000 : f32
    %83 = vector.broadcast %cst_17 : f32 to vector<16x16xf32>
    %84 = arith.select %82, %83, %67 : vector<16x16xi1>, vector<16x16xf32>
    %cst_18 = arith.constant dense<0xFF800000> : vector<16xf32>
    %85 = vector.multi_reduction <maximumf>, %84, %cst_18 [1] : vector<16x16xf32> to vector<16xf32>
    %86 = vector.shape_cast %85 : vector<16xf32> to vector<16x1xf32>
    %87 = vector.broadcast %86 : vector<16x1xf32> to vector<16x16xf32>
    %88 = arith.cmpf oge, %84, %87 : vector<16x16xf32>
    %cst_19 = arith.constant 1.600000e+01 : f32
    %89 = vector.broadcast %cst_19 : f32 to vector<16x16xf32>
    %90 = arith.select %88, %31, %89 : vector<16x16xi1>, vector<16x16xf32>
    %cst_20 = arith.constant dense<0x7F800000> : vector<16xf32>
    %91 = vector.multi_reduction <minimumf>, %90, %cst_20 [1] : vector<16x16xf32> to vector<16xf32>
    %92 = vector.shape_cast %91 : vector<16xf32> to vector<16x1xf32>
    %c3_i32 = arith.constant 3 : i32
    %93 = vector.broadcast %c3_i32 : i32 to vector<16x8xi32>
    %94 = arith.cmpi eq, %32, %93 : vector<16x8xi32>
    %95 = vector.shape_cast %92 : vector<16x1xf32> to vector<16x1xf32>
    %96 = vector.broadcast %95 : vector<16x1xf32> to vector<16x8xf32>
    %97 = arith.select %94, %96, %80 : vector<16x8xi1>, vector<16x8xf32>
    %98 = vector.broadcast %92 : vector<16x1xf32> to vector<16x16xf32>
    %99 = arith.cmpf oeq, %31, %98 : vector<16x16xf32>
    %cst_21 = arith.constant 0xFF800000 : f32
    %100 = vector.broadcast %cst_21 : f32 to vector<16x16xf32>
    %101 = arith.select %99, %100, %84 : vector<16x16xi1>, vector<16x16xf32>
    %cst_22 = arith.constant dense<0xFF800000> : vector<16xf32>
    %102 = vector.multi_reduction <maximumf>, %101, %cst_22 [1] : vector<16x16xf32> to vector<16xf32>
    %103 = vector.shape_cast %102 : vector<16xf32> to vector<16x1xf32>
    %104 = vector.broadcast %103 : vector<16x1xf32> to vector<16x16xf32>
    %105 = arith.cmpf oge, %101, %104 : vector<16x16xf32>
    %cst_23 = arith.constant 1.600000e+01 : f32
    %106 = vector.broadcast %cst_23 : f32 to vector<16x16xf32>
    %107 = arith.select %105, %31, %106 : vector<16x16xi1>, vector<16x16xf32>
    %cst_24 = arith.constant dense<0x7F800000> : vector<16xf32>
    %108 = vector.multi_reduction <minimumf>, %107, %cst_24 [1] : vector<16x16xf32> to vector<16xf32>
    %109 = vector.shape_cast %108 : vector<16xf32> to vector<16x1xf32>
    %c4_i32 = arith.constant 4 : i32
    %110 = vector.broadcast %c4_i32 : i32 to vector<16x8xi32>
    %111 = arith.cmpi eq, %32, %110 : vector<16x8xi32>
    %112 = vector.shape_cast %109 : vector<16x1xf32> to vector<16x1xf32>
    %113 = vector.broadcast %112 : vector<16x1xf32> to vector<16x8xf32>
    %114 = arith.select %111, %113, %97 : vector<16x8xi1>, vector<16x8xf32>
    %115 = vector.broadcast %109 : vector<16x1xf32> to vector<16x16xf32>
    %116 = arith.cmpf oeq, %31, %115 : vector<16x16xf32>
    %cst_25 = arith.constant 0xFF800000 : f32
    %117 = vector.broadcast %cst_25 : f32 to vector<16x16xf32>
    %118 = arith.select %116, %117, %101 : vector<16x16xi1>, vector<16x16xf32>
    %cst_26 = arith.constant dense<0xFF800000> : vector<16xf32>
    %119 = vector.multi_reduction <maximumf>, %118, %cst_26 [1] : vector<16x16xf32> to vector<16xf32>
    %120 = vector.shape_cast %119 : vector<16xf32> to vector<16x1xf32>
    %121 = vector.broadcast %120 : vector<16x1xf32> to vector<16x16xf32>
    %122 = arith.cmpf oge, %118, %121 : vector<16x16xf32>
    %cst_27 = arith.constant 1.600000e+01 : f32
    %123 = vector.broadcast %cst_27 : f32 to vector<16x16xf32>
    %124 = arith.select %122, %31, %123 : vector<16x16xi1>, vector<16x16xf32>
    %cst_28 = arith.constant dense<0x7F800000> : vector<16xf32>
    %125 = vector.multi_reduction <minimumf>, %124, %cst_28 [1] : vector<16x16xf32> to vector<16xf32>
    %126 = vector.shape_cast %125 : vector<16xf32> to vector<16x1xf32>
    %c5_i32 = arith.constant 5 : i32
    %127 = vector.broadcast %c5_i32 : i32 to vector<16x8xi32>
    %128 = arith.cmpi eq, %32, %127 : vector<16x8xi32>
    %129 = vector.shape_cast %126 : vector<16x1xf32> to vector<16x1xf32>
    %130 = vector.broadcast %129 : vector<16x1xf32> to vector<16x8xf32>
    %131 = arith.select %128, %130, %114 : vector<16x8xi1>, vector<16x8xf32>
    %132 = vector.broadcast %126 : vector<16x1xf32> to vector<16x16xf32>
    %133 = arith.cmpf oeq, %31, %132 : vector<16x16xf32>
    %cst_29 = arith.constant 0xFF800000 : f32
    %134 = vector.broadcast %cst_29 : f32 to vector<16x16xf32>
    %135 = arith.select %133, %134, %118 : vector<16x16xi1>, vector<16x16xf32>
    %cst_30 = arith.constant dense<0xFF800000> : vector<16xf32>
    %136 = vector.multi_reduction <maximumf>, %135, %cst_30 [1] : vector<16x16xf32> to vector<16xf32>
    %137 = vector.shape_cast %136 : vector<16xf32> to vector<16x1xf32>
    %138 = vector.broadcast %137 : vector<16x1xf32> to vector<16x16xf32>
    %139 = arith.cmpf oge, %135, %138 : vector<16x16xf32>
    %cst_31 = arith.constant 1.600000e+01 : f32
    %140 = vector.broadcast %cst_31 : f32 to vector<16x16xf32>
    %141 = arith.select %139, %31, %140 : vector<16x16xi1>, vector<16x16xf32>
    %cst_32 = arith.constant dense<0x7F800000> : vector<16xf32>
    %142 = vector.multi_reduction <minimumf>, %141, %cst_32 [1] : vector<16x16xf32> to vector<16xf32>
    %143 = vector.shape_cast %142 : vector<16xf32> to vector<16x1xf32>
    %c6_i32 = arith.constant 6 : i32
    %144 = vector.broadcast %c6_i32 : i32 to vector<16x8xi32>
    %145 = arith.cmpi eq, %32, %144 : vector<16x8xi32>
    %146 = vector.shape_cast %143 : vector<16x1xf32> to vector<16x1xf32>
    %147 = vector.broadcast %146 : vector<16x1xf32> to vector<16x8xf32>
    %148 = arith.select %145, %147, %131 : vector<16x8xi1>, vector<16x8xf32>
    %149 = vector.broadcast %143 : vector<16x1xf32> to vector<16x16xf32>
    %150 = arith.cmpf oeq, %31, %149 : vector<16x16xf32>
    %cst_33 = arith.constant 0xFF800000 : f32
    %151 = vector.broadcast %cst_33 : f32 to vector<16x16xf32>
    %152 = arith.select %150, %151, %135 : vector<16x16xi1>, vector<16x16xf32>
    %cst_34 = arith.constant dense<0xFF800000> : vector<16xf32>
    %153 = vector.multi_reduction <maximumf>, %152, %cst_34 [1] : vector<16x16xf32> to vector<16xf32>
    %154 = vector.shape_cast %153 : vector<16xf32> to vector<16x1xf32>
    %155 = vector.broadcast %154 : vector<16x1xf32> to vector<16x16xf32>
    %156 = arith.cmpf oge, %152, %155 : vector<16x16xf32>
    %cst_35 = arith.constant 1.600000e+01 : f32
    %157 = vector.broadcast %cst_35 : f32 to vector<16x16xf32>
    %158 = arith.select %156, %31, %157 : vector<16x16xi1>, vector<16x16xf32>
    %cst_36 = arith.constant dense<0x7F800000> : vector<16xf32>
    %159 = vector.multi_reduction <minimumf>, %158, %cst_36 [1] : vector<16x16xf32> to vector<16xf32>
    %160 = vector.shape_cast %159 : vector<16xf32> to vector<16x1xf32>
    %c7_i32 = arith.constant 7 : i32
    %161 = vector.broadcast %c7_i32 : i32 to vector<16x8xi32>
    %162 = arith.cmpi eq, %32, %161 : vector<16x8xi32>
    %163 = vector.shape_cast %160 : vector<16x1xf32> to vector<16x1xf32>
    %164 = vector.broadcast %163 : vector<16x1xf32> to vector<16x8xf32>
    %165 = arith.select %162, %164, %148 : vector<16x8xi1>, vector<16x8xf32>
    %166 = arith.fptosi %165 : vector<16x8xf32> to vector<16x8xi32>
    %c0_37 = arith.constant 0 : index
    %c0_38 = arith.constant 0 : index
    %c0_39 = arith.constant 0 : index
    %167 = vector.load %arg4[%c0_37, %c0_38, %c0_39] : memref<1x16x8xi32, #tpu.memory_space<vmem>>, vector<1x16x8xi32>
    %168 = vector.shape_cast %167 : vector<1x16x8xi32> to vector<16x8xi32>
    %169 = vector.shape_cast %166 : vector<16x8xi32> to vector<1x16x8xi32>
    tpu.vector_store %arg4[%c0_37, %c0_38, %c0_39], %169 {strides = array<i32>} : memref<1x16x8xi32, #tpu.memory_space<vmem>>, vector<1x16x8xi32>,
    return
  }
  func.func @transform_0(%arg0: i32, %arg1: i32) -> (i32, i32, i32) {
    %c0_i32 = arith.constant 0 : i32
    %c0_i32_0 = arith.constant 0 : i32
    return %arg0, %arg1, %c0_i32 : i32, i32, i32
  }
  func.func @transform_1(%arg0: i32, %arg1: i32) -> (i32, i32, i32) {
    %c0_i32 = arith.constant 0 : i32
    %c0_i32_0 = arith.constant 0 : i32
    %c0_i32_1 = arith.constant 0 : i32
    return %arg0, %c0_i32, %c0_i32_0 : i32, i32, i32
  }
  func.func @transform_2(%arg0: i32, %arg1: i32) -> (i32, i32, i32) {
    %c0_i32 = arith.constant 0 : i32
    %c0_i32_0 = arith.constant 0 : i32
    return %arg0, %arg1, %c0_i32 : i32, i32, i32
  }
}

</mosaic_0001>

<bundles_post_ra>
// kernel: tpu_custom_call.1
= control target key start
LH: loop header
LB: loop body
LE: loop exit
PB: predicated region body
PF: predicated region fallthrough
CT: control target
= control target key end

     0   :  { %s639_s9 = smov 0   ;;  %s641_s10 = smov 0   ;;  %s834_s0 = inlined_call_operand.vmem [shape: f32[2,16,3], index: 0, kind: input, shape index: {}]   ;;  %s835_s1 = inlined_call_operand.vmem [shape: f32[2,3,16], index: 1, kind: input, shape index: {}]   ;;  %s836_s2 = inlined_call_operand.vmem [shape: s32[2,16,8], index: 2, kind: output, shape index: {}]  }
   0x1   :  { %s643_s11 = smov 0  }
   0x2 LB: > { %s24_s12 = sadd.s32 1, %s615_s10  ;;  %p546_p0 = scmp.ge.s32.totalorder %s619_s11, 1  ;;  %s619_s11 = sphi %s643_s11, %s12_s11   ;;  %s615_s10 = sphi %s641_s10, %s838_s10   ;;  %s611_s9 = sphi %s639_s9, %s837_s9  }
   0x3   : > { %p26_p1 = scmp.ge.s32.totalorder %s24_s12, 2  ;;  %p142_p2 = scmp.lt.s32.totalorder %s619_s11, 3 }
   0x5   : > { %s840_s12 = smov (%p26_p1, %s24_s12), 0  ;;  %p143_p3 = pnand %p546_p0, %p142_p2 }
   0x6   : > { %p177_p4 = scmp.lt.s32.totalorder (!%p143_p3), %s611_s9, 1 }
   0x7   : > { %146 = sbr.rel (%p143_p3) target bundleno = 2056 (0x808), region = 28 }
   0xc   : > { %v621_v0 = vmov 1   ;;  %v622_v1 = vmov 0   ;;  %s842_s9 = smov (!%p177_p4, %s611_s9), 1  ;;  %v623_v2 = vmov 2   ;;  %vm257_vm0 = vcmask 130048  }
   0xd   : > { %594 = vset.pattern.permute.xlu1 %v621_v0  ;;  %593 = vset.pattern.permute.xlu0 %v622_v1  ;;  %s554_s13 = sshll.u32 %s842_s9, 4  ;;  %s549_s17 = sshll.u32 %s842_s9, 2  ;;  %v254_v36 = vlaneseq }
   0xe   : > { %595 = vset.pattern.permute.xlu2 %v623_v2  ;;  %s184_s16 = scalar_lea.vmem %s834_s0, %s554_s13  ;;  %s189_s20 = scalar_lea.vmem %s835_s1, %s549_s17 }
   0xf   : > { %v200_v3 = vld [vmem:[%s184_s16] sm:$0xff]  ;;  %v201_v4 = vld [vmem:[%s184_s16 + $0x8] sm:$0xff]  ;;  %v671_v37 = vand.u32 127, %v254_v36  ;;  %s198_s23 = scalar_lea.vmem %s836_s2, %s554_s13 }
  0x10   : > { %229 = vperm.xlu1 %594, %v200_v3   ;;  %213 = vperm.xlu0 %593, %v200_v3   ;;  %v202_v5 = vld [vmem:[%s189_s20] sm:$0x7] }
  0x11   : > { %242 = vperm.xlu2 %595, %v200_v3   ;;  %v203_v6 = vmul.f32 %v202_v5, %v202_v5  ;;  %v236_v12 = vperm.slane %v202_v5, 1  ;;  %v221_v13 = vperm.slane %v202_v5, 0  ;;  %v249_v14 = vperm.slane %v202_v5, 2 }
  0x12   : > { %v674_v38 = vcvt.s32.f32 %v671_v37 }
  0x13   : > { %v205_v7 = vrot.slane %v203_v6, 1  ;;  %v208_v9 = vrot.slane %v203_v6, 2 }
  0x15   : > { %v207_v8 = vadd.f32 %v205_v7, %v203_v6 }
  0x17   : > { %v210_v10 = vadd.f32 %v208_v9, %v207_v8 }
  0x18   : > { %233 = vperm.xlu1 %594, %v201_v4   ;;  %218 = vperm.xlu0 %593, %v201_v4  }
  0x19   : > { %246 = vperm.xlu2 %595, %v201_v4   ;;  %v224_v11 = vmul.f32 0.5, %v210_v10 }
  0x1b   : > { %v225_v16 = vperm.slane %v224_v11, 0 }
  0x20   : > { %596 = vset.pattern.permute.xlu0 %v623_v2 }
  0x6b   : > { %v243_v15 = vpop.permute.xlu2 %242 }
  0x6c   : > { %v250_v21 = vmul.f32 %v249_v14, %v243_v15 }
  0x73   : > { %v247_v29 = vpop.permute.xlu2 %246 }
  0x74   : > { %v251_v32 = vmul.f32 %v249_v14, %v247_v29 }
  0x82   : > { %v230_v17 = vpop.permute.xlu1 %229  ;;  %v214_v18 = vpop.permute.xlu0 %213 }
  0x83   : > { %v237_v19 = vmul.f32 %v236_v12, %v230_v17  ;;  %v222_v20 = vmul.f32 %v221_v13, %v214_v18 }
  0x85   : > { %v226_v22 = vsub.f32 %v222_v20, %v225_v16 }
  0x87   : > { %v239_v23 = vadd.f32 %v237_v19, %v226_v22 }
  0x89   : > { %v252_v24 = vadd.f32 %v250_v21, %v239_v23 }
  0x8a   : > { %v234_v25 = vpop.permute.xlu1 %233  ;;  %v219_v26 = vpop.permute.xlu0 %218 }
  0x8b   : > { %v223_v27 = vmul.f32 %v221_v13, %v219_v26  ;;  %v258_v28 = vsel %vm257_vm0, %v252_v24, -inf  ;;  %v238_v30 = vmul.f32 %v236_v12, %v234_v25 }
  0x8c   : > { %259 = vmax.xlane.f32.xlu0 %v258_v28 }
  0x8d   : > { %v227_v31 = vsub.f32 %v223_v27, %v225_v16 }
  0x8f   : > { %v240_v33 = vadd.f32 %v238_v30, %v227_v31 }
  0x91   : > { %v253_v34 = vadd.f32 %v251_v32, %v240_v33 }
  0x93   : > { %v261_v35 = vsel %vm257_vm0, %v253_v34, -inf }
  0x94   : > { %262 = vmax.xlane.f32.xlu1 %v261_v35 }
  0xff   : > { %v260_v39 = vpop.xlane.xlu0 %259 }
 0x100   : > { %vm264_vm1 = vcmp.ge.f32.partialorder %v252_v24, %v260_v39 }
 0x101   : > { %v266_v40 = vsel %vm264_vm1, %v674_v38, 16.0 }
 0x102   : > { %v268_v41 = vsel %vm257_vm0, %v266_v40, inf }
 0x103   : > { %269 = vmin.xlane.f32.xlu2 %v268_v41 }
 0x107   : > { %v263_v42 = vpop.xlane.xlu1 %262 }
 0x108   : > { %vm265_vm2 = vcmp.ge.f32.partialorder %v253_v34, %v263_v42 }
 0x109   : > { %v267_v43 = vsel %vm265_vm2, %v674_v38, 16.0 }
 0x10a   : > { %v271_v44 = vsel %vm257_vm0, %v267_v43, inf }
 0x10b   : > { %272 = vmin.xlane.f32.xlu2 %v271_v44 }
 0x176   : > { %v680_v45 = vpop.xlane.xlu2 %269 }
 0x177   : > { %vm277_vm3 = vcmp.eq.f32.partialorder %v674_v38, %v680_v45 }
 0x178   : > { %v279_v46 = vsel %vm277_vm3, -inf, %v252_v24 }
 0x179   : > { %v281_v47 = vsel %vm257_vm0, %v279_v46, -inf }
 0x17a   : > { %282 = vmax.xlane.f32.xlu0 %v281_v47 }
 0x17e   : > { %v685_v48 = vpop.xlane.xlu2 %272 }
 0x17f   : > { %vm278_vm4 = vcmp.eq.f32.partialorder %v674_v38, %v685_v48 }
 0x180   : > { %v280_v49 = vsel %vm278_vm4, -inf, %v253_v34 }
 0x181   : > { %v284_v50 = vsel %vm257_vm0, %v280_v49, -inf }
 0x182   : > { %285 = vmax.xlane.f32.xlu1 %v284_v50 }
 0x1ed   : > { %v283_v51 = vpop.xlane.xlu0 %282 }
 0x1ee   : > { %vm287_vm5 = vcmp.ge.f32.partialorder %v279_v46, %v283_v51 }
 0x1ef   : > { %v289_v52 = vsel %vm287_vm5, %v674_v38, 16.0 }
 0x1f0   : > { %v291_v53 = vsel %vm257_vm0, %v289_v52, inf }
 0x1f1   : > { %292 = vmin.xlane.f32.xlu2 %v291_v53 }
 0x1f5   : > { %v286_v54 = vpop.xlane.xlu1 %285 }
 0x1f6   : > { %vm288_vm6 = vcmp.ge.f32.partialorder %v280_v49, %v286_v54 }
 0x1f7   : > { %v290_v55 = vsel %vm288_vm6, %v674_v38, 16.0 }
 0x1f8   : > { %v294_v56 = vsel %vm257_vm0, %v290_v55, inf }
 0x1f9   : > { %295 = vmin.xlane.f32.xlu0 %v294_v56 }
 0x264   : > { %v694_v57 = vpop.xlane.xlu2 %292 }
 0x265   : > { %vm300_vm7 = vcmp.eq.f32.partialorder %v674_v38, %v694_v57 }
 0x266   : > { %v302_v58 = vsel %vm300_vm7, -inf, %v279_v46 }
 0x267   : > { %v304_v59 = vsel %vm257_vm0, %v302_v58, -inf }
 0x268   : > { %305 = vmax.xlane.f32.xlu1 %v304_v59 }
 0x26c   : > { %v699_v60 = vpop.xlane.xlu0 %295 }
 0x26d   : > { %vm301_vm8 = vcmp.eq.f32.partialorder %v674_v38, %v699_v60 }
 0x26e   : > { %v303_v61 = vsel %vm301_vm8, -inf, %v280_v49 }
 0x26f   : > { %v307_v62 = vsel %vm257_vm0, %v303_v61, -inf }
 0x270   : > { %308 = vmax.xlane.f32.xlu2 %v307_v62 }
 0x2db   : > { %v306_v63 = vpop.xlane.xlu1 %305 }
 0x2dc   : > { %vm310_vm9 = vcmp.ge.f32.partialorder %v302_v58, %v306_v63 }
 0x2dd   : > { %v312_v0 = vsel %vm310_vm9, %v674_v38, 16.0 }
 0x2de   : > { %v314_v1 = vsel %vm257_vm0, %v312_v0, inf }
 0x2df   : > { %315 = vmin.xlane.f32.xlu0 %v314_v1 }
 0x2e3   : > { %v309_v2 = vpop.xlane.xlu2 %308 }
 0x2e4   : > { %vm311_vm10 = vcmp.ge.f32.partialorder %v303_v61, %v309_v2 }
 0x2e5   : > { %v313_v3 = vsel %vm311_vm10, %v674_v38, 16.0 }
 0x2e6   : > { %v317_v4 = vsel %vm257_vm0, %v313_v3, inf }
 0x2e7   : > { %318 = vmin.xlane.f32.xlu1 %v317_v4 }
 0x352   : > { %v708_v5 = vpop.xlane.xlu0 %315 }
 0x353   : > { %vm323_vm11 = vcmp.eq.f32.partialorder %v674_v38, %v708_v5 }
 0x354   : > { %v325_v6 = vsel %vm323_vm11, -inf, %v302_v58 }
 0x355   : > { %v327_v7 = vsel %vm257_vm0, %v325_v6, -inf }
 0x356   : > { %328 = vmax.xlane.f32.xlu2 %v327_v7 }
 0x35a   : > { %v713_v8 = vpop.xlane.xlu1 %318 }
 0x35b   : > { %vm324_vm12 = vcmp.eq.f32.partialorder %v674_v38, %v713_v8 }
 0x35c   : > { %v326_v9 = vsel %vm324_vm12, -inf, %v303_v61 }
 0x35d   : > { %v330_v10 = vsel %vm257_vm0, %v326_v9, -inf }
 0x35e   : > { %331 = vmax.xlane.f32.xlu0 %v330_v10 }
 0x3c9   : > { %v329_v11 = vpop.xlane.xlu2 %328 }
 0x3ca   : > { %vm333_vm13 = vcmp.ge.f32.partialorder %v325_v6, %v329_v11 }
 0x3cb   : > { %v335_v12 = vsel %vm333_vm13, %v674_v38, 16.0 }
 0x3cc   : > { %v337_v13 = vsel %vm257_vm0, %v335_v12, inf }
 0x3cd   : > { %338 = vmin.xlane.f32.xlu1 %v337_v13 }
 0x3d1   : > { %v332_v14 = vpop.xlane.xlu0 %331 }
 0x3d2   : > { %vm334_vm14 = vcmp.ge.f32.partialorder %v326_v9, %v332_v14 }
 0x3d3   : > { %v336_v15 = vsel %vm334_vm14, %v674_v38, 16.0 }
 0x3d4   : > { %v340_v16 = vsel %vm257_vm0, %v336_v15, inf }
 0x3d5   : > { %341 = vmin.xlane.f32.xlu2 %v340_v16 }
 0x440   : > { %v722_v17 = vpop.xlane.xlu1 %338 }
 0x441   : > { %vm346_vm15 = vcmp.eq.f32.partialorder %v674_v38, %v722_v17 }
 0x442   : > { %v348_v18 = vsel %vm346_vm15, -inf, %v325_v6 }
 0x443   : > { %v350_v19 = vsel %vm257_vm0, %v348_v18, -inf }
 0x444   : > { %351 = vmax.xlane.f32.xlu0 %v350_v19 }
 0x448   : > { %v727_v20 = vpop.xlane.xlu2 %341 }
 0x449   : > { %vm347_vm1 = vcmp.eq.f32.partialorder %v674_v38, %v727_v20 }
 0x44a   : > { %v349_v21 = vsel %vm347_vm1, -inf, %v326_v9  ;;  %vm274_vm1 = vcmp.eq.s32.totalorder %v671_v37, 0 }
 0x44b   : > { %v353_v22 = vsel %vm257_vm0, %v349_v21, -inf  ;;  %v275_v9 = vsel %vm274_vm1, %v680_v45, 0.0  ;;  %v276_v14 = vsel %vm274_vm1, %v685_v48, 0.0 }
 0x44c   : > { %354 = vmax.xlane.f32.xlu1 %v353_v22 }
 0x4b7   : > { %v352_v23 = vpop.xlane.xlu0 %351 }
 0x4b8   : > { %vm356_vm2 = vcmp.ge.f32.partialorder %v348_v18, %v352_v23 }
 0x4b9   : > { %v358_v24 = vsel %vm356_vm2, %v674_v38, 16.0  ;;  %vm297_vm2 = vcmp.eq.s32.totalorder %v671_v37, 1 }
 0x4ba   : > { %v360_v25 = vsel %vm257_vm0, %v358_v24, inf  ;;  %v298_v10 = vsel %vm297_vm2, %v694_v57, %v275_v9 }
 0x4bb   : > { %361 = vmin.xlane.f32.xlu2 %v360_v25 }
 0x4bf   : > { %v355_v26 = vpop.xlane.xlu1 %354 }
 0x4c0   : > { %vm357_vm3 = vcmp.ge.f32.partialorder %v349_v21, %v355_v26 }
 0x4c1   : > { %v359_v27 = vsel %vm357_vm3, %v674_v38, 16.0  ;;  %vm320_vm3 = vcmp.eq.s32.totalorder %v671_v37, 2 }
 0x4c2   : > { %v363_v28 = vsel %vm257_vm0, %v359_v27, inf }
 0x4c3   : > { %364 = vmin.xlane.f32.xlu0 %v363_v28 }
 0x52e   : > { %v736_v29 = vpop.xlane.xlu2 %361 }
 0x52f   : > { %vm369_vm4 = vcmp.eq.f32.partialorder %v674_v38, %v736_v29 }
 0x530   : > { %v371_v30 = vsel %vm369_vm4, -inf, %v348_v18  ;;  %vm343_vm4 = vcmp.eq.s32.totalorder %v671_v37, 3 }
 0x531   : > { %v373_v31 = vsel %vm257_vm0, %v371_v30, -inf }
 0x532   : > { %374 = vmax.xlane.f32.xlu1 %v373_v31 }
 0x536   : > { %v741_v32 = vpop.xlane.xlu0 %364 }
 0x537   : > { %vm370_vm5 = vcmp.eq.f32.partialorder %v674_v38, %v741_v32 }
 0x538   : > { %v372_v33 = vsel %vm370_vm5, -inf, %v349_v21  ;;  %vm366_vm5 = vcmp.eq.s32.totalorder %v671_v37, 4 }
 0x539   : > { %v376_v34 = vsel %vm257_vm0, %v372_v33, -inf }
 0x53a   : > { %377 = vmax.xlane.f32.xlu2 %v376_v34 }
 0x5a5   : > { %v375_v35 = vpop.xlane.xlu1 %374 }
 0x5a6   : > { %vm379_vm6 = vcmp.ge.f32.partialorder %v371_v30, %v375_v35 }
 0x5a7   : > { %v381_v36 = vsel %vm379_vm6, %v674_v38, 16.0  ;;  %vm412_vm6 = vcmp.eq.s32.totalorder %v671_v37, 6 }
 0x5a8   : > { %v383_v39 = vsel %vm257_vm0, %v381_v36, inf }
 0x5a9   : > { %384 = vmin.xlane.f32.xlu0 %v383_v39 }
 0x5ad   : > { %v378_v40 = vpop.xlane.xlu2 %377 }
 0x5ae   : > { %vm380_vm7 = vcmp.ge.f32.partialorder %v372_v33, %v378_v40 }
 0x5af   : > { %v382_v41 = vsel %vm380_vm7, %v674_v38, 16.0  ;;  %vm435_vm7 = vcmp.eq.s32.totalorder %v671_v37, 7 }
 0x5b0   : > { %v386_v42 = vsel %vm257_vm0, %v382_v41, inf }
 0x5b1   : > { %387 = vmin.xlane.f32.xlu1 %v386_v42 }
 0x61c   : > { %v385_v43 = vpop.xlane.xlu0 %384 }
 0x61d   : > { %vm392_vm8 = vcmp.eq.f32.partialorder %v674_v38, %v385_v43 }
 0x61e   : > { %v394_v44 = vsel %vm392_vm8, -inf, %v371_v30 }
 0x61f   : > { %v396_v46 = vsel %vm257_vm0, %v394_v44, -inf }
 0x620   : > { %397 = vmax.xlane.f32.xlu2 %v396_v46 }
 0x624   : > { %v752_v47 = vpop.xlane.xlu1 %387 }
 0x625   : > { %vm393_vm9 = vcmp.eq.f32.partialorder %v674_v38, %v752_v47 }
 0x626   : > { %v395_v49 = vsel %vm393_vm9, -inf, %v372_v33  ;;  %vm440_vm9 = vcmask 64512  }
 0x627   : > { %v399_v50 = vsel %vm257_vm0, %v395_v49, -inf }
 0x628   : > { %400 = vmax.xlane.f32.xlu0 %v399_v50 }
 0x693   : > { %v398_v51 = vpop.xlane.xlu2 %397 }
 0x694   : > { %vm402_vm10 = vcmp.ge.f32.partialorder %v394_v44, %v398_v51 }
 0x695   : > { %v404_v52 = vsel %vm402_vm10, %v674_v38, 16.0 }
 0x696   : > { %v406_v53 = vsel %vm257_vm0, %v404_v52, inf }
 0x697   : > { %407 = vmin.xlane.f32.xlu1 %v406_v53 }
 0x69b   : > { %v401_v54 = vpop.xlane.xlu0 %400 }
 0x69c   : > { %vm403_vm11 = vcmp.ge.f32.partialorder %v395_v49, %v401_v54 }
 0x69d   : > { %v405_v55 = vsel %vm403_vm11, %v674_v38, 16.0 }
 0x69e   : > { %v409_v56 = vsel %vm257_vm0, %v405_v55, inf }
 0x69f   : > { %410 = vmin.xlane.f32.xlu2 %v409_v56 }
 0x70a   : > { %v408_v58 = vpop.xlane.xlu1 %407 }
 0x70b   : > { %vm415_vm12 = vcmp.eq.f32.partialorder %v674_v38, %v408_v58 }
 0x70c   : > { %v417_v59 = vsel %vm415_vm12, -inf, %v394_v44 }
 0x70d   : > { %v419_v61 = vsel %vm257_vm0, %v417_v59, -inf }
 0x70e   : > { %420 = vmax.xlane.f32.xlu0 %v419_v61 }
 0x712   : > { %v411_v62 = vpop.xlane.xlu2 %410 }
 0x713   : > { %vm416_vm13 = vcmp.eq.f32.partialorder %v674_v38, %v411_v62 }
 0x714   : > { %v418_v63 = vsel %vm416_vm13, -inf, %v395_v49 }
 0x715   : > { %v422_v0 = vsel %vm257_vm0, %v418_v63, -inf }
 0x716   : > { %423 = vmax.xlane.f32.xlu1 %v422_v0 }
 0x781   : > { %v421_v1 = vpop.xlane.xlu0 %420 }
 0x782   : > { %vm425_vm14 = vcmp.ge.f32.partialorder %v417_v59, %v421_v1 }
 0x783   : > { %v427_v2 = vsel %vm425_vm14, %v674_v38, 16.0 }
 0x784   : > { %v429_v3 = vsel %vm257_vm0, %v427_v2, inf }
 0x785   : > { %430 = vmin.xlane.f32.xlu2 %v429_v3 }
 0x789   : > { %v424_v4 = vpop.xlane.xlu1 %423 }
 0x78a   : > { %vm426_vm15 = vcmp.ge.f32.partialorder %v418_v63, %v424_v4 }
 0x78b   : > { %v428_v6 = vsel %vm426_vm15, %v674_v38, 16.0  ;;  %v321_v38 = vsel %vm320_vm3, %v708_v5, %v298_v10 }
 0x78c   : > { %v432_v7 = vsel %vm257_vm0, %v428_v6, inf  ;;  %vm389_vm0 = vcmp.eq.s32.totalorder %v671_v37, 5  ;;  %v344_v11 = vsel %vm343_vm4, %v722_v17, %v321_v38  ;;  %v299_v17 = vsel %vm297_vm2, %v699_v60, %v276_v14 }
 0x78d   : > { %433 = vmin.xlane.f32.xlu0 %v432_v7  ;;  %v367_v45 = vsel %vm366_vm5, %v736_v29, %v344_v11  ;;  %v322_v18 = vsel %vm320_vm3, %v713_v8, %v299_v17 }
 0x78e   : > { %v390_v57 = vsel %vm389_vm0, %v385_v43, %v367_v45  ;;  %v345_v48 = vsel %vm343_vm4, %v727_v20, %v322_v18 }
 0x78f   : > { %v413_v5 = vsel %vm412_vm6, %v408_v58, %v390_v57  ;;  %v368_v60 = vsel %vm366_vm5, %v741_v32, %v345_v48 }
 0x790   : > { %v391_v22 = vsel %vm389_vm0, %v752_v47, %v368_v60 }
 0x791   : > { %v414_v23 = vsel %vm412_vm6, %v411_v62, %v391_v22 }
 0x7f8   : > { %v431_v12 = vpop.xlane.xlu2 %430 }
 0x7f9   : > { %v436_v13 = vsel %vm435_vm7, %v431_v12, %v413_v5 }
 0x7fa   : > { %vm556_vm8 = vcmp.lt.s32.totalorder %v436_v13, 0  ;;  %v557_v15 = vceil.f32 %v436_v13  ;;  %v558_v16 = vfloor.f32 %v436_v13 }
 0x7fc   : > { %v559_v19 = vsel %vm556_vm8, %v557_v15, %v558_v16 }
 0x7fd   : > { %v560_v21 = vcvt.f32.s32 %v559_v19 }
 0x7ff   : > { %441 = vst.msk [vmem:[%s198_s23] sm:$0xff] %vm440_vm9, %v560_v21 }
 0x800   : > { %v434_v8 = vpop.xlane.xlu0 %433 }
 0x801   : > { %v437_v24 = vsel %vm435_vm7, %v434_v8, %v414_v23 }
 0x802   : > { %vm561_vm10 = vcmp.lt.s32.totalorder %v437_v24, 0  ;;  %v562_v25 = vceil.f32 %v437_v24  ;;  %v563_v20 = vfloor.f32 %v437_v24 }
 0x804   : > { %v564_v26 = vsel %vm561_vm10, %v562_v25, %v563_v20 }
 0x805   : > { %v565_v27 = vcvt.f32.s32 %v564_v26 }
 0x807   : > { %442 = vst.msk [vmem:[%s198_s23 + $0x8] sm:$0xff] %vm440_vm9, %v565_v27 }
 0x808 PF: > { %s12_s11 = sadd.s32 1, %s619_s11   ;;  %s837_s9 = smov %s615_s10 }
 0x809   : > { %p9_p5 = scmp.ge.s32.totalorder %s12_s11, 4   ;;  %s838_s10 = smov %s840_s12 }
 0x80b   :  { %11 = sbr.rel (!%p9_p5) target bundleno = 2 (0x2), region = 61 }

</bundles_post_ra>
